<compile_context>
chip_gen: v5e
topology: v5e:2x2
jax: 0.10.0
libtpu: 0.0.40
codegen_flags: <defaults>
</compile_context>

<pallas_src>
import functools
import math

import numpy as np
import jax
import jax.numpy as jnp
from jax.experimental import pallas as pl
from jax.experimental.pallas import tpu as pltpu


def _build_pe(max_len: int, d_model: int) -> jnp.ndarray:
    """Deterministic sin/cos table, identical to the torch __init__."""
    position = np.arange(max_len, dtype=np.float32)[:, None]              # (L, 1)
    div_term = np.exp(
        np.arange(0, d_model, 2, dtype=np.float32) * (-math.log(10000.0) / d_model)
    )                                                                     # (ceil(D/2),)
    pe = np.zeros((max_len, d_model), dtype=np.float32)
    pe[:, 0::2] = np.sin(position * div_term)
    n_cos = pe[:, 1::2].shape[1]                                          # guard odd d_model
    pe[:, 1::2] = np.cos(position * div_term)[:, :n_cos]
    return jnp.asarray(pe[:, None, :])                                    # (L, 1, D)


def _pe_add_kernel(x_ref, pe_ref, o_ref):
    # x_ref: (TS, B, D), pe_ref: (TS, 1, D) -> broadcast add over the batch dim.
    o_ref[...] = (x_ref[...] + pe_ref[...]).astype(o_ref.dtype)


def _pe_add_dropout_kernel(seed_ref, x_ref, pe_ref, o_ref, *, threshold_i32, inv_keep):
    # Training-mode dropout: keep with prob (1-p), scale kept values by 1/(1-p).
    pltpu.prng_seed(seed_ref[0] + pl.program_id(0))
    y = (x_ref[...] + pe_ref[...]).astype(jnp.float32) * jnp.float32(inv_keep)
    bits = pltpu.bitcast(pltpu.prng_random_bits(y.shape), jnp.int32)
    # keep iff uint32(bits) >= uint32(p * 2^32); unsigned compare done in signed
    # space by flipping the sign bit of both sides (threshold pre-flipped).
    keep = (bits ^ jnp.int32(-(1 << 31))) >= jnp.int32(threshold_i32)
    o_ref[...] = jnp.where(keep, y, jnp.float32(0.0)).astype(o_ref.dtype)


def _pick_seq_tile(S, B, D, itemsize, target_bytes=2 * 1024 * 1024):
    """Tile enough sequence rows per grid step for ~2 MiB x-blocks (VMEM-safe
    on v5e/v6e/v7x with double buffering: ~3 arrays * 2 bufs * 2 MiB)."""
    row_bytes = max(1, B * D * itemsize)
    return int(max(1, min(S, target_bytes // row_bytes)))


def positional_encoding(x, pe, *, dropout_p=0.1, training=False, seed=0, seq_tile=None):
    """x: (S, B, D); pe: (max_len, 1, D) float32."""
    S, B, D = x.shape
    pe_s = pe[:S]  # (S, 1, D) — glue slice, as in forward()

    TS = int(seq_tile) if seq_tile is not None else _pick_seq_tile(S, B, D, x.dtype.itemsize)
    TS = max(1, min(TS, S))
    grid = (pl.cdiv(S, TS),)

    # TODO(synk): when d_model < 128 the lane dim is under-filled (masked vst);
    # a lane-dense repack (e.g. flattening batch into the lane dim) would help,
    # but realistic d_model (>=128) is already lane-dense so it is omitted here.
    x_spec = pl.BlockSpec((TS, B, D), lambda s, *_: (s, 0, 0))
    pe_spec = pl.BlockSpec((TS, 1, D), lambda s, *_: (s, 0, 0))
    out_spec = pl.BlockSpec((TS, B, D), lambda s, *_: (s, 0, 0))
    out_shape = jax.ShapeDtypeStruct((S, B, D), x.dtype)

    compiler_params = pltpu.CompilerParams(
        dimension_semantics=("parallel",),        # megacore sharding on v7x
        vmem_limit_bytes=32 * 1024 * 1024,        # raise v5e's 16 MiB default; safe on v7x
    )

    if (not training) or dropout_p == 0.0:
        # Eval mode: nn.Dropout is identity.
        return pl.pallas_call(
            _pe_add_kernel,
            out_shape=out_shape,
            grid_spec=pltpu.PrefetchScalarGridSpec(
                num_scalar_prefetch=0,
                grid=grid,
                in_specs=[x_spec, pe_spec],
                out_specs=out_spec,
            ),
            compiler_params=compiler_params,
        )(x, pe_s)

    p = float(dropout_p)
    threshold = min(max(int(round(p * (1 << 32))), 0), (1 << 32) - 1)
    kern = functools.partial(
        _pe_add_dropout_kernel,
        threshold_i32=threshold - (1 << 31),      # sign-bit-flipped uint32 threshold
        inv_keep=1.0 / (1.0 - p),
    )
    seed_arr = jnp.asarray([seed], dtype=jnp.int32)
    return pl.pallas_call(
        kern,
        out_shape=out_shape,
        grid_spec=pltpu.PrefetchScalarGridSpec(
            num_scalar_prefetch=1,
            grid=grid,
            in_specs=[x_spec, pe_spec],
            out_specs=out_spec,
        ),
        compiler_params=compiler_params,
    )(seed_arr, x, pe_s)


if __name__ == "__main__":
    key = jax.random.PRNGKey(0)

    # --- small shape matching the module's convention (seq, batch, d_model) ---
    S, B, D = 8, 2, 32
    MAX_LEN = 64                 # stand-in for max_len=5000 (same construction)

    x = jax.random.normal(key, (S, B, D), dtype=jnp.float32)
    pe = _build_pe(MAX_LEN, D)

    out = positional_encoding(x, pe, dropout_p=0.1, training=False)
    out = jax.block_until_ready(out)

    ref = x + pe[:S]             # eval-mode forward: x + pe[:S]
    assert out.shape == x.shape and out.dtype == x.dtype
    np.testing.assert_allclose(np.asarray(out), np.asarray(ref), rtol=1e-6, atol=1e-6)

    # --- second check: multi-step grid (TS < S) with larger, lane-dense d_model ---
    S2, B2, D2 = 256, 4, 128
    x2 = jax.random.normal(jax.random.PRNGKey(1), (S2, B2, D2), dtype=jnp.float32)
    pe2 = _build_pe(S2, D2)
    out2 = jax.block_until_ready(
        positional_encoding(x2, pe2, dropout_p=0.1, training=False, seq_tile=64)
    )
    np.testing.assert_allclose(np.asarray(out2), np.asarray(x2 + pe2[:S2]),
                               rtol=1e-6, atol=1e-6)

    print("KERNEL_OK")
</pallas_src>

<mosaic_0001>
module attributes {stable_mosaic.version = 11 : i64} {
  func.func @_pe_add_kernel(%arg0: i32, %arg1: memref<8x2x32xf32, #tpu.memory_space<vmem>>, %arg2: memref<8x1x32xf32, #tpu.memory_space<vmem>>, %arg3: memref<8x2x32xf32, #tpu.memory_space<vmem>>) attributes {dimension_semantics = [#tpu.dimension_semantics<parallel>], iteration_bounds = array<i64: 1>, scalar_prefetch = 0 : i64, scratch_operands = 0 : i64, tpu.core_type = #tpu.core_type<tc>, window_params = [{transform_indices = @transform_0, window_bounds = array<i64: 8, 2, 32>}, {transform_indices = @transform_1, window_bounds = array<i64: 8, 1, 32>}, {transform_indices = @transform_2, window_bounds = array<i64: 8, 2, 32>}]} {
    %c0 = arith.constant 0 : index
    %c0_0 = arith.constant 0 : index
    %c0_1 = arith.constant 0 : index
    %0 = vector.load %arg1[%c0, %c0_0, %c0_1] : memref<8x2x32xf32, #tpu.memory_space<vmem>>, vector<8x2x32xf32>
    %c0_2 = arith.constant 0 : index
    %c0_3 = arith.constant 0 : index
    %c0_4 = arith.constant 0 : index
    %1 = vector.load %arg2[%c0_2, %c0_3, %c0_4] : memref<8x1x32xf32, #tpu.memory_space<vmem>>, vector<8x1x32xf32>
    %2 = vector.broadcast %1 : vector<8x1x32xf32> to vector<8x2x32xf32>
    %3 = arith.addf %0, %2 : vector<8x2x32xf32>
    %c0_5 = arith.constant 0 : index
    %c0_6 = arith.constant 0 : index
    %c0_7 = arith.constant 0 : index
    %4 = vector.load %arg3[%c0_5, %c0_6, %c0_7] : memref<8x2x32xf32, #tpu.memory_space<vmem>>, vector<8x2x32xf32>
    tpu.vector_store %arg3[%c0_5, %c0_6, %c0_7], %3 {strides = array<i32>} : memref<8x2x32xf32, #tpu.memory_space<vmem>>, vector<8x2x32xf32>,
    return
  }
  func.func @transform_0(%arg0: i32) -> (i32, i32, i32) {
    %c0_i32 = arith.constant 0 : i32
    %c0_i32_0 = arith.constant 0 : i32
    %c0_i32_1 = arith.constant 0 : i32
    return %arg0, %c0_i32, %c0_i32_0 : i32, i32, i32
  }
  func.func @transform_1(%arg0: i32) -> (i32, i32, i32) {
    %c0_i32 = arith.constant 0 : i32
    %c0_i32_0 = arith.constant 0 : i32
    %c0_i32_1 = arith.constant 0 : i32
    return %arg0, %c0_i32, %c0_i32_0 : i32, i32, i32
  }
  func.func @transform_2(%arg0: i32) -> (i32, i32, i32) {
    %c0_i32 = arith.constant 0 : i32
    %c0_i32_0 = arith.constant 0 : i32
    %c0_i32_1 = arith.constant 0 : i32
    return %arg0, %c0_i32, %c0_i32_0 : i32, i32, i32
  }
}

</mosaic_0001>

<bundles_post_ra>
// kernel: tpu_custom_call.1
= control target key start
LH: loop header
LB: loop body
LE: loop exit
PB: predicated region body
PF: predicated region fallthrough
CT: control target
= control target key end

     0   :  { %7 = vsyncpa [#allocation3], 0  ;;  %s266_s0 = inlined_call_operand.hbm [shape: f32[8,2,32], index: 0, kind: input, shape index: {}]   ;;  %s267_s1 = inlined_call_operand.hbm [shape: f32[8,1,32], index: 1, kind: input, shape index: {}]   ;;  %s268_s2 = inlined_call_operand.hbm [shape: f32[8,2,32], index: 2, kind: output, shape index: {}]  }
   0x1   :  { %8 = vsyncpa [#allocation6], 0 }
   0x2   :  { %9 = vsyncpa [#allocation4], 0  ;;  %s14_s11 = sshll.u32 %s266_s0, 4  ;;  %s214_s12 = smov [#allocation2]   ;;  %s15_s11 = int_to_ptr.hbm [resolvable:$true] %s14_s11 }
   0x3   :  { %s16_s13 = sshll.u32 %s214_s12, 4  ;;  %s27_s16 = sshll.u32 %s267_s1, 4  ;;  %s17_s13 = int_to_ptr.vmem [resolvable:$true] %s16_s13  ;;  %s28_s16 = int_to_ptr.hbm [resolvable:$true] %s27_s16 }
   0x4   :  { %s215_s17 = smov 32   ;;  %s216_s18 = smov 2  }
   0x5   :  { %22 = dma.hbm_to_vmem [thread:$0]  %s15_s11, 256, %s17_s13, [#allocation3], %s215_s17, %s215_s17, %s216_s18  }
   0x6   :  { %s217_s19 = smov [#allocation5]   ;;  %s218_s21 = smov 16  }
   0x7   :  { %s29_s20 = sshll.u32 %s217_s19, 4  ;;  %s219_s0 = smov 1   ;;  %s30_s20 = int_to_ptr.vmem [resolvable:$true] %s29_s20 }
   0x8   :  { %35 = dma.hbm_to_vmem [thread:$0]  %s28_s16, 128, %s30_s20, [#allocation6], %s218_s21, %s218_s21, %s219_s0  }
   0x9   :  { %208 = dma.done.wait [#allocation3], 256  }
   0xa   :  { %209 = vsyncadd [#allocation3], 4294967040 }
   0xb   :  { %210 = dma.done.wait [#allocation6], 128  }
   0xc   :  { %211 = vsyncadd [#allocation6], 4294967168  ;;  %vm92_vm0 = vcmask 254976   ;;  %s220_s22 = smov [#allocation7]   ;;  %s107_s25 = sshll.u32 %s268_s2, 4  ;;  %s108_s25 = int_to_ptr.hbm [resolvable:$true] %s107_s25 }
   0xd   :  { %s245_s1 = sshll.u32 %s220_s22, 4  ;;  %v44_v0 = vld [vmem:[#allocation2] sm:$0x3]  ;;  %v128_v1 = vld [vmem:[#allocation5] ss:$0 sm:$0xff]  ;;  %s106_s1 = int_to_ptr.vmem [resolvable:$true] %s245_s1 }
   0xe   :  { %v45_v2 = vld [vmem:[#allocation2 + $0x2] sm:$0x3]  ;;  %v129_v3 = vld [vmem:[#allocation5 + $0x1] ss:$0 sm:$0xff]  ;;  %v84_v4 = vadd.f32 %v128_v1, %v44_v0  ;;  %v46_v5 = vld [vmem:[#allocation2 + $0x4] sm:$0x3] }
   0xf   :  { %v130_v6 = vld [vmem:[#allocation5 + $0x2] ss:$0 sm:$0xff]  ;;  %v85_v7 = vadd.f32 %v129_v3, %v45_v2  ;;  %v47_v8 = vld [vmem:[#allocation2 + $0x6] sm:$0x3]  ;;  %v131_v9 = vld [vmem:[#allocation5 + $0x3] ss:$0 sm:$0xff] }
  0x10   :  { %93 = vst.msk [vmem:[#allocation7] sm:$0x3] %vm92_vm0, %v84_v4  ;;  %v86_v10 = vadd.f32 %v130_v6, %v46_v5  ;;  %v48_v11 = vld [vmem:[#allocation2 + $0x8] sm:$0x3]  ;;  %v87_v12 = vadd.f32 %v131_v9, %v47_v8  ;;  %v132_v13 = vld [vmem:[#allocation5 + $0x4] ss:$0 sm:$0xff] }
  0x11   :  { %94 = vst.msk [vmem:[#allocation7 + $0x2] sm:$0x3] %vm92_vm0, %v85_v7  ;;  %v49_v14 = vld [vmem:[#allocation2 + $0xa] sm:$0x3]  ;;  %v133_v15 = vld [vmem:[#allocation5 + $0x5] ss:$0 sm:$0xff]  ;;  %v88_v16 = vadd.f32 %v132_v13, %v48_v11 }
  0x12   :  { %95 = vst.msk [vmem:[#allocation7 + $0x4] sm:$0x3] %vm92_vm0, %v86_v10  ;;  %v50_v17 = vld [vmem:[#allocation2 + $0xc] sm:$0x3]  ;;  %v89_v18 = vadd.f32 %v133_v15, %v49_v14  ;;  %v134_v19 = vld [vmem:[#allocation5 + $0x6] ss:$0 sm:$0xff] }
  0x13   :  { %96 = vst.msk [vmem:[#allocation7 + $0x6] sm:$0x3] %vm92_vm0, %v87_v12  ;;  %v51_v20 = vld [vmem:[#allocation2 + $0xe] sm:$0x3]  ;;  %v135_v21 = vld [vmem:[#allocation5 + $0x7] ss:$0 sm:$0xff]  ;;  %v90_v22 = vadd.f32 %v134_v19, %v50_v17 }
  0x14   :  { %97 = vst.msk [vmem:[#allocation7 + $0x8] sm:$0x3] %vm92_vm0, %v88_v16  ;;  %v91_v23 = vadd.f32 %v135_v21, %v51_v20 }
  0x15   :  { %98 = vst.msk [vmem:[#allocation7 + $0xa] sm:$0x3] %vm92_vm0, %v89_v18 }
  0x16   :  { %99 = vst.msk [vmem:[#allocation7 + $0xc] sm:$0x3] %vm92_vm0, %v90_v22 }
  0x17   :  { %100 = vst.msk [vmem:[#allocation7 + $0xe] sm:$0x3] %vm92_vm0, %v91_v23 }
  0x18   :  { %113 = dma.vmem_to_hbm [thread:$0]  %s106_s1, 256, %s108_s25, [#allocation4], %s215_s17, %s215_s17, %s216_s18  }
  0x19   :  { %212 = dma.done.wait [#allocation4], 256  }
  0x1a   :  { %213 = vsyncadd [#allocation4], 4294967040 }
  0x1b   :  { %118 = vsyncpa [#allocation3], 1 }
  0x1c   :  { %119 = vsyncpa [#allocation6], 1 }
  0x1d   :  { %120 = vsyncpa [#allocation4], 1 }

</bundles_post_ra>
